<compile_context>
chip_gen: v6e
topology: v6e:2x2x1
jax: 0.10.0
libtpu: 0.0.40
codegen_flags: <defaults>
</compile_context>

<pallas_src>
import math

import jax
import jax.numpy as jnp
from jax import lax
from jax.experimental import pallas as pl
from jax.experimental.pallas import tpu as pltpu


def _round_up(x, m):
    return ((x + m - 1) // m) * m


def _pick_tile(dim_pad, pref, quantum=128):
    """Largest multiple of `quantum` that divides dim_pad and is <= pref.
    If dim_pad <= pref, use the full extent (single tile, no padding waste)."""
    if dim_pad <= pref:
        return dim_pad
    best = quantum
    t = quantum
    while t <= pref:
        if dim_pad % t == 0:
            best = t
        t += quantum
    return best


# ----------------------------- Pallas kernels ------------------------------ #
def _lora_kernel_fused(x_ref, wt_ref, b_ref, low_ref, bt_ref, o_ref):
    """K collapsed: whole contraction in one MXU call per output tile.
    W^T block index depends only on j (outer grid axis) so it stays resident
    across consecutive M tiles.  low = x @ A^T was computed outside."""
    base = jnp.dot(x_ref[...], wt_ref[...],
                   preferred_element_type=jnp.float32)           # [tm, tn] f32
    lora = jnp.dot(low_ref[...], bt_ref[...],
                   preferred_element_type=jnp.float32)           # [tm, tn] f32
    o_ref[...] = (base + b_ref[...] + lora).astype(o_ref.dtype)


def _lora_kernel_kred(x_ref, wt_ref, b_ref, low_ref, bt_ref, o_ref, acc_ref):
    """Fallback for large K: f32 accumulator across the k reduction axis."""
    k = pl.program_id(2)

    @pl.when(k == 0)
    def _init():
        acc_ref[...] = jnp.zeros_like(acc_ref)

    acc_ref[...] += jnp.dot(x_ref[...], wt_ref[...],
                            preferred_element_type=jnp.float32)

    @pl.when(k == pl.num_programs(2) - 1)
    def _finalize():
        lora = jnp.dot(low_ref[...], bt_ref[...],
                       preferred_element_type=jnp.float32)
        o_ref[...] = (acc_ref[...] + b_ref[...] + lora).astype(o_ref.dtype)


def lora_linear_pallas(x2d_p, wt_p, b2_p, low_p, bt_p, *, tm, tn, tk,
                       collapse_k, flops, bytes_accessed, out_dtype):
    """All inputs pre-padded: x2d_p [M_pad,K_pad] bf16, wt_p [K_pad,N_pad] bf16,
    b2_p [1,N_pad] f32, low_p [M_pad,r_pad] bf16 (= x @ A^T), bt_p [r_pad,N_pad]
    bf16 (already scaled by alpha/r)."""
    M_pad, K_pad = x2d_p.shape
    N_pad = wt_p.shape[1]
    r_pad = bt_p.shape[0]
    ce = pl.CostEstimate(flops=flops, transcendentals=0,
                         bytes_accessed=bytes_accessed)

    if collapse_k:
        # N outer, M inner -> W^T (0, j) block not re-DMA'd across i steps.
        grid = (N_pad // tn, M_pad // tm)
        return pl.pallas_call(
            _lora_kernel_fused,
            out_shape=jax.ShapeDtypeStruct((M_pad, N_pad), out_dtype),
            grid_spec=pltpu.PrefetchScalarGridSpec(
                num_scalar_prefetch=0,
                grid=grid,
                in_specs=[
                    pl.BlockSpec((tm, K_pad), lambda j, i: (i, 0)),   # x
                    pl.BlockSpec((K_pad, tn), lambda j, i: (0, j)),   # W^T
                    pl.BlockSpec((1, tn), lambda j, i: (0, j)),       # bias
                    pl.BlockSpec((tm, r_pad), lambda j, i: (i, 0)),   # x@A^T
                    pl.BlockSpec((r_pad, tn), lambda j, i: (0, j)),   # s*B^T
                ],
                out_specs=pl.BlockSpec((tm, tn), lambda j, i: (i, j))),
            compiler_params=pltpu.CompilerParams(
                dimension_semantics=("parallel", "parallel")),
            cost_estimate=ce,
        )(x2d_p, wt_p, b2_p, low_p, bt_p)

    # K-reduction fallback (K too large to hold a full contraction stripe).
    grid = (N_pad // tn, M_pad // tm, K_pad // tk)
    return pl.pallas_call(
        _lora_kernel_kred,
        out_shape=jax.ShapeDtypeStruct((M_pad, N_pad), out_dtype),
        grid_spec=pltpu.PrefetchScalarGridSpec(
            num_scalar_prefetch=0,
            grid=grid,
            in_specs=[
                pl.BlockSpec((tm, tk), lambda j, i, k: (i, k)),       # x
                pl.BlockSpec((tk, tn), lambda j, i, k: (k, j)),       # W^T
                pl.BlockSpec((1, tn), lambda j, i, k: (0, j)),        # bias
                pl.BlockSpec((tm, r_pad), lambda j, i, k: (i, 0)),    # x@A^T
                pl.BlockSpec((r_pad, tn), lambda j, i, k: (0, j)),    # s*B^T
            ],
            out_specs=pl.BlockSpec((tm, tn), lambda j, i, k: (i, j)),
            scratch_shapes=[pltpu.VMEM((tm, tn), jnp.float32)]),
        compiler_params=pltpu.CompilerParams(
            dimension_semantics=("parallel", "parallel", "arbitrary")),
        cost_estimate=ce,
    )(x2d_p, wt_p, b2_p, low_p, bt_p)


# --------------------------- Adapter (glue / JAX) --------------------------- #
class LoRAAdapterJAX:
    """Mirrors LoRA_Adapter for a base model whose nn.Linear target has been
    replaced by LoRALinear; the LoRALinear forward runs in the fused kernel."""

    def __init__(self, key, in_features, out_features, r, lora_alpha=1.0, *,
                 tm=512, tn=256, tk=512, compute_dtype=jnp.bfloat16,
                 out_dtype=None, collapse_k=None,
                 vmem_budget_bytes=28 * 1024 * 1024):
        assert r > 0
        k_w, k_b, k_a = jax.random.split(key, 3)
        # PyTorch nn.Linear default init: U(-1/sqrt(fan_in), 1/sqrt(fan_in))
        bound = 1.0 / math.sqrt(in_features)
        self.w = jax.random.uniform(k_w, (out_features, in_features),
                                    jnp.float32, -bound, bound)
        self.b = jax.random.uniform(k_b, (out_features,),
                                    jnp.float32, -bound, bound)
        # lora_A: kaiming_uniform_(a=sqrt(5)) -> U(-1/sqrt(fan_in), ...)
        self.lora_a = jax.random.uniform(k_a, (r, in_features),
                                         jnp.float32, -bound, bound)
        # lora_B: zeros (reset_lora_parameters)
        self.lora_b = jnp.zeros((out_features, r), jnp.float32)
        self.scaling = float(lora_alpha) / float(r)
        self.in_features = in_features
        self.out_features = out_features
        self.r = r
        self.compute_dtype = compute_dtype
        self.out_dtype = out_dtype          # None -> inherit x.dtype
        self.collapse_k = collapse_k        # None -> auto (VMEM budget)
        self.vmem_budget_bytes = vmem_budget_bytes
        self.tm_pref = tm
        self.tn_pref = tn
        self.tk_pref = tk
        self._prepare()

    def set_lora_b(self, lora_b):
        self.lora_b = lora_b
        self._prepare()

    def _prepare(self):
        """Pre-transpose, pre-scale, pad and bf16-cast the weights once.
        Padding is 128-granular (not tile-granular) to avoid zero-FLOP waste."""
        K, N, r = self.in_features, self.out_features, self.r
        K_pad = _round_up(K, 128)
        N_pad = _round_up(N, 128)
        r_pad = _round_up(r, 16)
        cd = self.compute_dtype

        wt = jnp.transpose(self.w).astype(cd)                          # [K, N]
        a = self.lora_a.astype(cd)                                     # [r, K]
        bt = (jnp.transpose(self.lora_b) * self.scaling).astype(cd)    # [r, N]
        b2 = self.b.reshape(1, N).astype(jnp.float32)

        self.wt_p = jnp.pad(wt, ((0, K_pad - K), (0, N_pad - N)))
        self.a_p = jnp.pad(a, ((0, r_pad - r), (0, K_pad - K)))
        self.bt_p = jnp.pad(bt, ((0, r_pad - r), (0, N_pad - N)))
        self.b2_p = jnp.pad(b2, ((0, 0), (0, N_pad - N)))
        self.K_pad, self.N_pad, self.r_pad = K_pad, N_pad, r_pad
        self.tn = _pick_tile(N_pad, self.tn_pref)

    def _collapsed_footprint(self, tm, out_bytes):
        """Double-buffered VMEM bytes for the K-collapsed layout."""
        cd_b = jnp.dtype(self.compute_dtype).itemsize
        blocks = (tm * self.K_pad * cd_b            # x
                  + self.K_pad * self.tn * cd_b     # W^T
                  + tm * self.r_pad * cd_b          # x@A^T
                  + self.r_pad * self.tn * cd_b     # s*B^T
                  + self.tn * 4                     # bias
                  + tm * self.tn * out_bytes)       # out
        return 2 * blocks

    def __call__(self, x):
        # x: [batch, seq, in_features]  (lora_dropout=0.0 -> identity)
        B, S, K = x.shape
        assert K == self.in_features
        M = B * S
        if M <= self.tm_pref:
            M_pad = max(_round_up(M, 16), 16)
            tm = M_pad
        else:
            M_pad = _round_up(M, 128)
            tm = _pick_tile(M_pad, self.tm_pref)

        cd = self.compute_dtype
        out_dtype = self.out_dtype if self.out_dtype is not None else x.dtype
        out_bytes = jnp.dtype(out_dtype).itemsize

        if self.collapse_k is None:
            collapse_k = (self._collapsed_footprint(tm, out_bytes)
                          <= self.vmem_budget_bytes)
        else:
            collapse_k = self.collapse_k
        tk = self.K_pad if collapse_k else _pick_tile(self.K_pad, self.tk_pref)

        x2d = x.reshape(M, K).astype(cd)
        x2d_p = jnp.pad(x2d, ((0, M_pad - M), (0, self.K_pad - K)))

        # LoRA stage 1 hoisted out of the kernel: tiny [M, r] matmul done once,
        # f32 accumulation on the MXU, cast to compute dtype for stage 2.
        low_p = jnp.dot(x2d_p, self.a_p.T,
                        preferred_element_type=jnp.float32).astype(cd)

        N, r = self.out_features, self.r
        flops = 2 * M * N * K + 2 * M * self.r_pad * N
        bytes_accessed = int(x2d_p.nbytes + self.wt_p.nbytes + low_p.nbytes
                             + self.bt_p.nbytes + self.b2_p.nbytes
                             + M_pad * self.N_pad * out_bytes)

        y_p = lora_linear_pallas(x2d_p, self.wt_p, self.b2_p, low_p, self.bt_p,
                                 tm=tm, tn=self.tn, tk=tk,
                                 collapse_k=collapse_k, flops=flops,
                                 bytes_accessed=bytes_accessed,
                                 out_dtype=out_dtype)
        return y_p[:M, :N].reshape(B, S, N)


# ------------------------------- Reference ---------------------------------- #
def _reference(x, adapter):
    """Pure-JAX reference with matching numerics (bf16 params, f32 accum)."""
    hp = lax.Precision.HIGHEST
    cd = adapter.compute_dtype
    B, S, K = x.shape
    xb = x.reshape(B * S, K).astype(cd).astype(jnp.float32)
    wt = jnp.transpose(adapter.w).astype(cd).astype(jnp.float32)
    a = adapter.lora_a.astype(cd).astype(jnp.float32)
    bt = (jnp.transpose(adapter.lora_b) * adapter.scaling
          ).astype(cd).astype(jnp.float32)
    base = jnp.dot(xb, wt, precision=hp) + adapter.b
    low = jnp.dot(xb, a.T, precision=hp).astype(cd).astype(jnp.float32)
    out = base + jnp.dot(low, bt, precision=hp)
    return out.reshape(B, S, -1).astype(x.dtype)


# ----------------------------------- main ----------------------------------- #
if __name__ == "__main__":
    key = jax.random.PRNGKey(0)
    k_p1, k_x1, k_b1, k_p2, k_x2, k_b2, k_p3, k_x3, k_b3 = jax.random.split(key, 9)

    # ---- test 1: module-consistent small shapes (single-tile, K collapsed) ----
    batch, seq, in_f, out_f, r = 2, 8, 32, 32, 4
    adapter = LoRAAdapterJAX(k_p1, in_f, out_f, r, lora_alpha=2.0)
    x = jax.random.normal(k_x1, (batch, seq, in_f), jnp.float32)

    y = adapter(x)
    jax.block_until_ready(y)
    ref = _reference(x, adapter)
    assert y.shape == (batch, seq, out_f)
    assert jnp.allclose(y, ref, atol=2e-2, rtol=2e-2), \
        float(jnp.max(jnp.abs(y - ref)))

    # Non-zero lora_B exercises the low-rank path (init keeps B at zeros,
    # matching PyTorch reset_lora_parameters).
    adapter.set_lora_b(jax.random.normal(k_b1, (out_f, r), jnp.float32) * 0.1)
    y = adapter(x)
    jax.block_until_ready(y)
    ref = _reference(x, adapter)
    assert jnp.allclose(y, ref, atol=2e-2, rtol=2e-2), \
        float(jnp.max(jnp.abs(y - ref)))

    # ---- test 2: multi-tile grid, K collapsed, W^T resident across M tiles,
    #              non-divisible M handled by 128-granular padding ----
    adapter2 = LoRAAdapterJAX(k_p2, 256, 384, r=8, lora_alpha=16.0,
                              tm=128, tn=128)
    adapter2.set_lora_b(jax.random.normal(k_b2, (384, 8), jnp.float32) * 0.1)
    x2 = jax.random.normal(k_x2, (2, 120, 256), jnp.float32)   # M = 240
    y2 = adapter2(x2)
    jax.block_until_ready(y2)
    ref2 = _reference(x2, adapter2)
    assert y2.shape == (2, 120, 384)
    assert jnp.allclose(y2, ref2, atol=2e-2, rtol=2e-2), \
        float(jnp.max(jnp.abs(y2 - ref2)))

    # ---- test 3: forced K-reduction fallback path (accumulator + pl.when) ----
    adapter3 = LoRAAdapterJAX(k_p3, 256, 256, r=4, lora_alpha=8.0,
                              tm=128, tn=128, tk=128, collapse_k=False)
    adapter3.set_lora_b(jax.random.normal(k_b3, (256, 4), jnp.float32) * 0.1)
    x3 = jax.random.normal(k_x3, (1, 200, 256), jnp.float32)   # M = 200
    y3 = adapter3(x3)
    jax.block_until_ready(y3)
    ref3 = _reference(x3, adapter3)
    assert y3.shape == (1, 200, 256)
    assert jnp.allclose(y3, ref3, atol=2e-2, rtol=2e-2), \
        float(jnp.max(jnp.abs(y3 - ref3)))

    print("KERNEL_OK")
</pallas_src>

<mosaic_0001>
module attributes {stable_mosaic.version = 11 : i64} {
  func.func @_lora_kernel_fused(%arg0: i32, %arg1: i32, %arg2: memref<16x128xbf16, #tpu.memory_space<vmem>>, %arg3: memref<128x128xbf16, #tpu.memory_space<vmem>>, %arg4: memref<1x128xf32, #tpu.memory_space<vmem>>, %arg5: memref<16x16xbf16, #tpu.memory_space<vmem>>, %arg6: memref<16x128xbf16, #tpu.memory_space<vmem>>, %arg7: memref<16x128xf32, #tpu.memory_space<vmem>>) attributes {dimension_semantics = [#tpu.dimension_semantics<parallel>, #tpu.dimension_semantics<parallel>], iteration_bounds = array<i64: 1, 1>, scalar_prefetch = 0 : i64, scratch_operands = 0 : i64, tpu.core_type = #tpu.core_type<tc>, window_params = [{transform_indices = @transform_0, window_bounds = array<i64: 16, 128>}, {transform_indices = @transform_1, window_bounds = array<i64: 128, 128>}, {transform_indices = @transform_2, window_bounds = array<i64: 1, 128>}, {transform_indices = @transform_3, window_bounds = array<i64: 16, 16>}, {transform_indices = @transform_4, window_bounds = array<i64: 16, 128>}, {transform_indices = @transform_5, window_bounds = array<i64: 16, 128>}]} {
    %c0 = arith.constant 0 : index
    %c0_0 = arith.constant 0 : index
    %0 = vector.load %arg2[%c0, %c0_0] : memref<16x128xbf16, #tpu.memory_space<vmem>>, vector<16x128xbf16>
    %c0_1 = arith.constant 0 : index
    %c0_2 = arith.constant 0 : index
    %1 = vector.load %arg3[%c0_1, %c0_2] : memref<128x128xbf16, #tpu.memory_space<vmem>>, vector<128x128xbf16>
    %cst = arith.constant dense<0.000000e+00> : vector<16x128xf32>
    %2 = tpu.matmul %0, %1, %cst {dimension_numbers = #tpu.dot_dimension_numbers<[1], [0], [0], [1], [0, 0, 1, 1], [], []>} : vector<16x128xbf16>, vector<128x128xbf16>, vector<16x128xf32> -> vector<16x128xf32>
    %c0_3 = arith.constant 0 : index
    %c0_4 = arith.constant 0 : index
    %3 = vector.load %arg5[%c0_3, %c0_4] : memref<16x16xbf16, #tpu.memory_space<vmem>>, vector<16x16xbf16>
    %c0_5 = arith.constant 0 : index
    %c0_6 = arith.constant 0 : index
    %4 = vector.load %arg6[%c0_5, %c0_6] : memref<16x128xbf16, #tpu.memory_space<vmem>>, vector<16x128xbf16>
    %cst_7 = arith.constant dense<0.000000e+00> : vector<16x128xf32>
    %5 = tpu.matmul %3, %4, %cst_7 {dimension_numbers = #tpu.dot_dimension_numbers<[1], [0], [0], [1], [0, 0, 1, 1], [], []>} : vector<16x16xbf16>, vector<16x128xbf16>, vector<16x128xf32> -> vector<16x128xf32>
    %c0_8 = arith.constant 0 : index
    %c0_9 = arith.constant 0 : index
    %6 = vector.load %arg4[%c0_8, %c0_9] : memref<1x128xf32, #tpu.memory_space<vmem>>, vector<1x128xf32>
    %7 = vector.broadcast %6 : vector<1x128xf32> to vector<16x128xf32>
    %8 = arith.addf %2, %7 : vector<16x128xf32>
    %9 = arith.addf %8, %5 : vector<16x128xf32>
    %c0_10 = arith.constant 0 : index
    %c0_11 = arith.constant 0 : index
    %10 = vector.load %arg7[%c0_10, %c0_11] : memref<16x128xf32, #tpu.memory_space<vmem>>, vector<16x128xf32>
    tpu.vector_store %arg7[%c0_10, %c0_11], %9 {strides = array<i32>} : memref<16x128xf32, #tpu.memory_space<vmem>>, vector<16x128xf32>,
    return
  }
  func.func @transform_0(%arg0: i32, %arg1: i32) -> (i32, i32) {
    %c0_i32 = arith.constant 0 : i32
    %c0_i32_0 = arith.constant 0 : i32
    return %arg1, %c0_i32 : i32, i32
  }
  func.func @transform_1(%arg0: i32, %arg1: i32) -> (i32, i32) {
    %c0_i32 = arith.constant 0 : i32
    %c0_i32_0 = arith.constant 0 : i32
    return %c0_i32, %arg0 : i32, i32
  }
  func.func @transform_2(%arg0: i32, %arg1: i32) -> (i32, i32) {
    %c0_i32 = arith.constant 0 : i32
    %c0_i32_0 = arith.constant 0 : i32
    return %c0_i32, %arg0 : i32, i32
  }
  func.func @transform_3(%arg0: i32, %arg1: i32) -> (i32, i32) {
    %c0_i32 = arith.constant 0 : i32
    %c0_i32_0 = arith.constant 0 : i32
    return %arg1, %c0_i32 : i32, i32
  }
  func.func @transform_4(%arg0: i32, %arg1: i32) -> (i32, i32) {
    %c0_i32 = arith.constant 0 : i32
    %c0_i32_0 = arith.constant 0 : i32
    return %c0_i32, %arg0 : i32, i32
  }
  func.func @transform_5(%arg0: i32, %arg1: i32) -> (i32, i32) {
    %c0_i32 = arith.constant 0 : i32
    return %arg1, %arg0 : i32, i32
  }
}

</mosaic_0001>

<bundles_post_ra>
// kernel: tpu_custom_call.1
= control target key start
LH: loop header
LB: loop body
LE: loop exit
PB: predicated region body
PF: predicated region fallthrough
CT: control target
= control target key end

     0   :  { %10 = vsyncpa [#allocation3], 0  ;;  %s531_s0 = inlined_call_operand.hbm [shape: bf16[16,128], index: 0, kind: input, shape index: {}]   ;;  %s532_s1 = inlined_call_operand.hbm [shape: bf16[128,128], index: 1, kind: input, shape index: {}]   ;;  %s533_s2 = inlined_call_operand.vmem [shape: f32[1,128], index: 2, kind: input, shape index: {}]   ;;  %s534_s3 = inlined_call_operand.hbm [shape: bf16[16,16], index: 3, kind: input, shape index: {}]   ;;  %s535_s4 = inlined_call_operand.hbm [shape: bf16[16,128], index: 4, kind: input, shape index: {}]   ;;  %s536_s5 = inlined_call_operand.hbm [shape: f32[16,128], index: 5, kind: output, shape index: {}]  }
   0x1   :  { %11 = vsyncpa [#allocation6], 0 }
   0x2   :  { %12 = vsyncpa [#allocation9], 0 }
   0x3   :  { %13 = vsyncpa [#allocation4], 0  ;;  %s460_s18 = smov [#allocation5]   ;;  %s461_s20 = smov [#allocation2]  }
   0x4   :  { %s31_s19 = sshll.u32 %s460_s18, 4  ;;  %s19_s21 = sshll.u32 %s461_s20, 4  ;;  %s32_s19 = int_to_ptr.vmem [resolvable:$true] %s31_s19  ;;  %s20_s21 = int_to_ptr.vmem [resolvable:$true] %s19_s21 }
   0x5   :  { %s360_s22 = scalar_lea.vmem %s32_s19, 1024  ;;  %p365_p1 = scmp.lt.s32.totalorder %s32_s19, %s32_s19 }
   0x6   :  { %p361_p0 = scmp.ne.s32.totalorder %s32_s19, %s360_s22  ;;  %p366_p2 = scmp.lt.s32.totalorder %s360_s22, %s360_s22 }
   0x8   :  { %p367_p3 = por %p366_p2, %p365_p1 }
   0xa   :  { %p368_p4 = pnand %p367_p3, %p361_p0 }
   0xc   :  { %371 = shalt.err (!%p368_p4)
}
   0xd   :  { %s462_s23 = smov 64   ;;  %s463_s24 = smov 4  }
   0xe   :  { %37 = dma.hbm_to_vmem [thread:$0]  %s532_s1, 1024, %s32_s19, [#allocation6], %s462_s23, %s462_s23, %s463_s24  }
   0xf   :  { %s380_s27 = scalar_lea.vmem %s20_s21, 128  ;;  %p385_p6 = scmp.lt.s32.totalorder %s20_s21, %s20_s21 }
  0x10   :  { %p381_p5 = scmp.ne.s32.totalorder %s20_s21, %s380_s27  ;;  %p386_p7 = scmp.lt.s32.totalorder %s380_s27, %s380_s27 }
  0x12   :  { %p387_p8 = por %p386_p7, %p385_p6 }
  0x14   :  { %p388_p9 = pnand %p387_p8, %p381_p5 }
  0x16   :  { %391 = shalt.err (!%p388_p9)
}
  0x17   :  { %25 = dma.hbm_to_vmem [thread:$0]  %s531_s0, 128, %s20_s21, [#allocation3], %s462_s23, %s462_s23, %s463_s24  }
  0x18   :  { %s464_s30 = smov [#allocation7]   ;;  %s465_s7 = smov [#allocation8]  }
  0x19   :  { %s45_s6 = sshll.u32 %s464_s30, 4  ;;  %s57_s8 = sshll.u32 %s465_s7, 4  ;;  %s46_s6 = int_to_ptr.vmem [resolvable:$true] %s45_s6  ;;  %s58_s8 = int_to_ptr.vmem [resolvable:$true] %s57_s8 }
  0x1a   :  { %s400_s1 = scalar_lea.vmem %s46_s6, 128  ;;  %p405_p11 = scmp.lt.s32.totalorder %s46_s6, %s46_s6 }
  0x1b   :  { %p401_p10 = scmp.ne.s32.totalorder %s46_s6, %s400_s1  ;;  %p406_p12 = scmp.lt.s32.totalorder %s400_s1, %s400_s1 }
  0x1d   :  { %p407_p13 = por %p406_p12, %p405_p11 }
  0x1f   :  { %p408_p0 = pnand %p407_p13, %p401_p10 }
  0x21   :  { %411 = shalt.err (!%p408_p0)
}
  0x22   :  { %51 = dma.hbm_to_vmem [thread:$0]  %s534_s3, 128, %s46_s6, [#allocation6], %s462_s23, %s462_s23, %s463_s24  }
  0x23   :  { %s420_s0 = scalar_lea.vmem %s58_s8, 128  ;;  %p425_p2 = scmp.lt.s32.totalorder %s58_s8, %s58_s8 }
  0x24   :  { %p421_p1 = scmp.ne.s32.totalorder %s58_s8, %s420_s0  ;;  %p426_p3 = scmp.lt.s32.totalorder %s420_s0, %s420_s0 }
  0x26   :  { %p427_p4 = por %p426_p3, %p425_p2 }
  0x28   :  { %p428_p5 = pnand %p427_p4, %p421_p1 }
  0x2a   :  { %431 = shalt.err (!%p428_p5)
}
  0x2b   :  { %63 = dma.hbm_to_vmem [thread:$0]  %s535_s4, 128, %s58_s8, [#allocation9], %s462_s23, %s462_s23, %s463_s24  }
  0x2c   :  { %452 = dma.done.wait [#allocation3], 128  }
  0x2d   :  { %453 = vsyncadd [#allocation3], 4294967168 }
  0x2e   :  { %454 = dma.done.wait [#allocation6], 1152  }
  0x2f   :  { %455 = vsyncadd [#allocation6], 4294966144 }
  0x30   :  { %456 = dma.done.wait [#allocation9], 128  }
  0x31   :  { %457 = vsyncadd [#allocation9], 4294967168  ;;  %v466_v0 = vmov 0.0   ;;  %vm467_vm0 = vmmov 0   ;;  %v341_v1 = vld [vmem:[#allocation5 + $0x38] sm:$0xff]   ;;  %v342_v2 = vld [vmem:[#allocation5 + $0x30] sm:$0xff]  }
  0x32   :  { %310 = vmatprep.subr.bf16.mxu1 %v466_v0  ;;  %304 = vmatprep.subr.bf16.mxu0 %v466_v0  ;;  %v343_v3 = vld [vmem:[#allocation5 + $0x28] sm:$0xff]   ;;  %v349_v5 = vld [vmem:[#allocation7] sm:$0xff]   ;;  %vm110_vm1 = vcmask 130048   ;;  %v345_v7 = vld [vmem:[#allocation5 + $0x18] sm:$0xff]   ;;  %s468_s13 = smov [#allocation10]  }
  0x33   :  { %306 = vmatprep.mubr.msk.bf16.mxu0 %vm467_vm0, %v466_v0  ;;  %326 = vmatprep.mubr.msk.bf16.mxu1 %vm467_vm0, %v466_v0  ;;  %v347_v4 = vld [vmem:[#allocation8] sm:$0xff]   ;;  %v344_v6 = vld [vmem:[#allocation5 + $0x20] sm:$0xff]   ;;  %v346_v8 = vld [vmem:[#allocation5 + $0x10] sm:$0xff]   ;;  %s266_s14 = sshll.u32 %s468_s13, 4  ;;  %s267_s14 = int_to_ptr.vmem [resolvable:$true] %s266_s14 }
  0x34   :  { %311 = vmatpush3.bf16.msra.mxu1 %v341_v1  ;;  %305 = vmatpush3.bf16.msra.mxu0 %v347_v4  ;;  %v348_v9 = vld [vmem:[#allocation5 + $0x8] sm:$0xff]   ;;  %v350_v10 = vld [vmem:[#allocation5] sm:$0xff]   ;;  %v351_v11 = vld [vmem:[#allocation2] sm:$0xff]   ;;  %s432_s15 = scalar_lea.vmem %s267_s14, 256  ;;  %p437_p7 = scmp.lt.s32.totalorder %s267_s14, %s267_s14 }
  0x35   :  { %312 = vmatprep.subr.bf16.mxu1 %v466_v0  ;;  %v283_v16 = vld [vmem:[%s533_s2] ss:$0 sm:$0xff]  ;;  %p433_p6 = scmp.ne.s32.totalorder %s267_s14, %s432_s15  ;;  %p438_p8 = scmp.lt.s32.totalorder %s432_s15, %s432_s15 }
  0x37   :  { %307 = vmatmul.mubr.msk.bf16.vlgmr.msra.gmra.mxu0 %vm110_vm1, %v349_v5  ;;  %p439_p9 = por %p438_p8, %p437_p7 }
  0x38   :  { %313 = vmatpush3.bf16.msra.mxu1 %v342_v2 }
  0x39   :  { %314 = vmatprep.subr.bf16.mxu1 %v466_v0  ;;  %p440_p10 = pnand %p439_p9, %p433_p6 }
  0x3c   :  { %315 = vmatpush3.bf16.msra.mxu1 %v343_v3 }
  0x3d   :  { %316 = vmatprep.subr.bf16.mxu1 %v466_v0 }
  0x40   :  { %317 = vmatpush3.bf16.msra.mxu1 %v344_v6 }
  0x41   :  { %318 = vmatprep.subr.bf16.mxu1 %v466_v0 }
  0x44   :  { %319 = vmatpush3.bf16.msra.mxu1 %v345_v7 }
  0x45   :  { %320 = vmatprep.subr.bf16.mxu1 %v466_v0 }
  0x48   :  { %321 = vmatpush3.bf16.msra.mxu1 %v346_v8 }
  0x49   :  { %322 = vmatprep.subr.bf16.mxu1 %v466_v0 }
  0x4c   :  { %323 = vmatpush3.bf16.msra.mxu1 %v348_v9 }
  0x4d   :  { %324 = vmatprep.subr.bf16.mxu1 %v466_v0 }
  0x50   :  { %325 = vmatpush3.bf16.msra.mxu1 %v350_v10 }
  0x53   :  { %327 = vmatmul.mubr.bf16.vlgmr.msra.gmra.mxu1 %v351_v11 }
  0xf7   :  { %v148_v12 = vpop.f32.mrf.mxu0 }
  0xf9   :  { %v308_v13 = vpop.f32.mrf.mxu0 }
  0xfb   :  { %v151_v14 = vpop.f32.mrf.mxu0 }
  0xfd   :  { %v309_v15 = vpop.f32.mrf.mxu0 }
 0x113   :  { %v250_v17 = vpop.f32.mrf.mxu1 }
 0x114   :  { %v251_v18 = vadd.f32 %v283_v16, %v250_v17 }
 0x115   :  { %v328_v19 = vpop.f32.mrf.mxu1 }
 0x116   :  { %v257_v20 = vadd.f32 %v251_v18, %v148_v12 }
 0x117   :  { %v253_v21 = vpop.f32.mrf.mxu1 }
 0x118   :  { %259 = vst [vmem:[#allocation10] sm:$0xff] %v257_v20  ;;  %v254_v22 = vadd.f32 %v283_v16, %v253_v21 }
 0x119   :  { %v329_v23 = vpop.f32.mrf.mxu1 }
 0x11a   :  { %v258_v24 = vadd.f32 %v254_v22, %v151_v14 }
 0x11c   :  { %260 = vst [vmem:[#allocation10 + $0x8] sm:$0xff] %v258_v24 }
 0x11d   :  { %443 = shalt.err (!%p440_p10)
}
 0x11e   :  { %s469_s2 = smov 128   ;;  %s470_s16 = smov 8  }
 0x11f   :  { %272 = dma.vmem_to_hbm [thread:$0]  %s267_s14, 256, %s536_s5, [#allocation4], %s469_s2, %s469_s2, %s470_s16  }
 0x120   :  { %458 = dma.done.wait [#allocation4], 256  }
 0x121   :  { %459 = vsyncadd [#allocation4], 4294967040 }
 0x122   :  { %276 = vsyncpa [#allocation3], 1 }
 0x123   :  { %277 = vsyncpa [#allocation6], 1 }
 0x124   :  { %278 = vsyncpa [#allocation9], 1 }
 0x125   :  { %279 = vsyncpa [#allocation4], 1 }

</bundles_post_ra>
